<compile_context>
chip_gen: v5e
topology: v5e:2x2
jax: 0.10.0
libtpu: 0.0.40
codegen_flags: <defaults>
</compile_context>

<pallas_src>
import functools

import jax
import jax.numpy as jnp
from jax.experimental import pallas as pl
from jax.experimental.pallas import tpu as pltpu

IN_FEATURES = 784       # 1 * 28 * 28  (kept unpadded — full-extent block dim)
HIDDEN = 128
OUT_FEATURES = 100
OUT_PAD = 128           # lane-dense output width (zero-padded, exact)

MAX_BB = 2048           # VMEM cap: 2 * 2048 * 784 * 4B ~= 12.3 MiB x-buffers


def _round_up(n, m):
    return ((n + m - 1) // m) * m


def _cdiv(a, b):
    return -(-a // b)


def _mlp_kernel(x_ref, w1_ref, b1_ref, w2_ref, b2_ref, o_ref):
    """Fused relu(relu(x @ W1 + b1) @ W2 + b2) on one (bb, 784) batch tile.

    Matmuls run on the MXU with f32 accumulation; bias + ReLU stay in f32 on
    the VPU (v5e-safe: no bf16 VPU there).  Any bf16 cast of the x tile
    happens here, on VMEM-resident data (no extra HBM pass).
    """
    x = x_ref[...].astype(w1_ref.dtype)      # no-op for f32
    # Layer 1: (bb, 784) @ (784, 128) -> (bb, 128) f32.
    h = jnp.dot(x, w1_ref[...], preferred_element_type=jnp.float32)
    h = jnp.maximum(h + b1_ref[...], 0.0)
    # Layer 2: (bb, 128) @ (128, 128) -> (bb, 128) f32.
    y = jnp.dot(h.astype(w2_ref.dtype), w2_ref[...],
                preferred_element_type=jnp.float32)
    y = jnp.maximum(y + b2_ref[...], 0.0)
    o_ref[...] = y.astype(o_ref.dtype)


@functools.partial(jax.jit, static_argnames=("block_b", "matmul_dtype"))
def client_model_forward(x, w1, b1, w2, b2, *, block_b=512,
                         matmul_dtype=jnp.float32):
    """x: (B, 1, 28, 28) float32  ->  (B, 100) float32.

    block_b: target batch tile (sweep 512-1024 for throughput); the actual
    tile is chosen to nearly divide B (minimal zero-row padding), kept >= 2
    tiles for large B (v7x megacore), and capped at MAX_BB for VMEM headroom.
    matmul_dtype: jnp.float32 (exact) or jnp.bfloat16 (weights cast once in
    the wrapper, x cast per-tile in VMEM; f32 accumulation kept).
    """
    B = x.shape[0]
    x2d = x.reshape(B, -1)                    # torch.nn.Flatten equivalent
    assert x2d.shape[1] == IN_FEATURES

    # ---- batch tiling: minimal padding, >=2 tiles when there is real work ---
    target = max(8, min(block_b, _round_up(B, 8)))
    n_tiles = _cdiv(B, target)
    if n_tiles == 1 and B >= 64:
        n_tiles = 2                           # v7x: feed both TensorCores
    bb = min(_round_up(_cdiv(B, n_tiles), 8), MAX_BB)
    n_tiles = _cdiv(B, bb)
    Bp = n_tiles * bb

    # Only pad batch rows, and only when needed (usually Bp == B -> no copy).
    x_p = x2d if Bp == B else jnp.pad(x2d, ((0, Bp - B), (0, 0)))

    # Weights / biases: tiny one-time layout work (N padded to lane-dense 128).
    w1p = w1                                   # (784, 128), unpadded K
    w2p = jnp.pad(w2, ((0, 0), (0, OUT_PAD - OUT_FEATURES)))
    b1p = b1.reshape(1, HIDDEN).astype(jnp.float32)
    b2p = jnp.pad(b2.reshape(1, OUT_FEATURES).astype(jnp.float32),
                  ((0, 0), (0, OUT_PAD - OUT_FEATURES)))

    md = jnp.dtype(matmul_dtype)
    if md != jnp.dtype(jnp.float32):
        # Cast ONLY the weights (about 0.5 MiB, once); x streams in its native
        # dtype and is cast per-tile inside the kernel.
        w1p = w1p.astype(md)
        w2p = w2p.astype(md)

    cost = pl.CostEstimate(
        flops=2 * Bp * (IN_FEATURES * HIDDEN + HIDDEN * OUT_PAD),
        transcendentals=0,
        bytes_accessed=(x_p.size * x_p.dtype.itemsize
                        + w1p.size * w1p.dtype.itemsize
                        + w2p.size * w2p.dtype.itemsize
                        + (b1p.size + b2p.size) * 4
                        + Bp * OUT_PAD * 4),
    )

    out_p = pl.pallas_call(
        _mlp_kernel,
        out_shape=jax.ShapeDtypeStruct((Bp, OUT_PAD), jnp.float32),
        grid_spec=pltpu.PrefetchScalarGridSpec(
            num_scalar_prefetch=0,
            grid=(n_tiles,),
            in_specs=[
                # batch tile of the flattened input; 784 = full last dim.
                pl.BlockSpec((bb, IN_FEATURES), lambda i: (i, 0)),
                # grid-invariant weights / biases (same block every step;
                # Pallas does not re-DMA an unchanged block).
                pl.BlockSpec((IN_FEATURES, HIDDEN), lambda i: (0, 0)),
                pl.BlockSpec((1, HIDDEN), lambda i: (0, 0)),
                pl.BlockSpec((HIDDEN, OUT_PAD), lambda i: (0, 0)),
                pl.BlockSpec((1, OUT_PAD), lambda i: (0, 0)),
            ],
            # lane-dense (bb, 128) output block -> unmasked full-width stores.
            out_specs=pl.BlockSpec((bb, OUT_PAD), lambda i: (i, 0)),
        ),
        compiler_params=pltpu.CompilerParams(
            dimension_semantics=("parallel",),   # shard batch tiles over TCs
            vmem_limit_bytes=32 << 20,           # explicit, v7x(64 MiB)-safe
        ),
        cost_estimate=cost,
    )(x_p, w1p, b1p, w2p, b2p)

    # Slice the zero-padded rows/columns back off (exact).  The column slice
    # could be pushed into the SplitNN server model if it accepts a (B, 128)
    # activation with 28 zero columns.
    return out_p[:B, :OUT_FEATURES]


def init_params(key):
    """Deterministic init mirroring torch.nn.Linear.reset_parameters():
    weight, bias ~ U(-1/sqrt(fan_in), 1/sqrt(fan_in)).
    Weights stored transposed as (in, out) for the kernel."""
    k1, k2, k3, k4 = jax.random.split(key, 4)
    bound1 = 1.0 / jnp.sqrt(IN_FEATURES)
    bound2 = 1.0 / jnp.sqrt(HIDDEN)
    w1 = jax.random.uniform(k1, (IN_FEATURES, HIDDEN), jnp.float32,
                            -bound1, bound1)
    b1 = jax.random.uniform(k2, (1, HIDDEN), jnp.float32, -bound1, bound1)
    w2 = jax.random.uniform(k3, (HIDDEN, OUT_FEATURES), jnp.float32,
                            -bound2, bound2)
    b2 = jax.random.uniform(k4, (1, OUT_FEATURES), jnp.float32,
                            -bound2, bound2)
    return w1, b1, w2, b2


def reference_forward(x, w1, b1, w2, b2):
    x2d = x.reshape(x.shape[0], -1)
    h = jnp.maximum(x2d @ w1 + b1, 0.0)
    return jnp.maximum(h @ w2 + b2, 0.0)


if __name__ == "__main__":
    key = jax.random.PRNGKey(0)
    kx, kp = jax.random.split(key)

    batch = 8
    x = jax.random.normal(kx, (batch, 1, 28, 28), jnp.float32)
    w1, b1, w2, b2 = init_params(kp)

    ref = reference_forward(x, w1, b1, w2, b2)

    # Exact f32 path.
    out = client_model_forward(x, w1, b1, w2, b2)
    out = jax.block_until_ready(out)
    assert out.shape == (batch, OUT_FEATURES), out.shape
    assert jnp.allclose(out, ref, atol=1e-4, rtol=1e-4), "f32 mismatch vs reference"

    # bf16-weight / f32-accumulate path (v6e / v7x perf option), looser tol.
    out_bf16 = client_model_forward(x, w1, b1, w2, b2,
                                    matmul_dtype=jnp.bfloat16)
    out_bf16 = jax.block_until_ready(out_bf16)
    assert jnp.allclose(out_bf16, ref, atol=5e-2, rtol=5e-2), "bf16 mismatch"

    print("KERNEL_OK")
</pallas_src>

<mosaic_0001>
module attributes {stable_mosaic.version = 11 : i64} {
  func.func @_mlp_kernel(%arg0: i32, %arg1: memref<8x784xf32, #tpu.memory_space<vmem>>, %arg2: memref<784x128xf32, #tpu.memory_space<vmem>>, %arg3: memref<1x128xf32, #tpu.memory_space<vmem>>, %arg4: memref<128x128xf32, #tpu.memory_space<vmem>>, %arg5: memref<1x128xf32, #tpu.memory_space<vmem>>, %arg6: memref<8x128xf32, #tpu.memory_space<vmem>>) attributes {dimension_semantics = [#tpu.dimension_semantics<parallel>], iteration_bounds = array<i64: 1>, scalar_prefetch = 0 : i64, scratch_operands = 0 : i64, tpu.core_type = #tpu.core_type<tc>, window_params = [{transform_indices = @transform_0, window_bounds = array<i64: 8, 784>}, {pipeline_mode = #tpu.pipeline_mode<synchronous>, transform_indices = @transform_1, window_bounds = array<i64: 784, 128>}, {pipeline_mode = #tpu.pipeline_mode<synchronous>, transform_indices = @transform_2, window_bounds = array<i64: 1, 128>}, {pipeline_mode = #tpu.pipeline_mode<synchronous>, transform_indices = @transform_3, window_bounds = array<i64: 128, 128>}, {pipeline_mode = #tpu.pipeline_mode<synchronous>, transform_indices = @transform_4, window_bounds = array<i64: 1, 128>}, {transform_indices = @transform_5, window_bounds = array<i64: 8, 128>}]} {
    %c0 = arith.constant 0 : index
    %c0_0 = arith.constant 0 : index
    %0 = vector.load %arg1[%c0, %c0_0] : memref<8x784xf32, #tpu.memory_space<vmem>>, vector<8x784xf32>
    %c0_1 = arith.constant 0 : index
    %c0_2 = arith.constant 0 : index
    %1 = vector.load %arg2[%c0_1, %c0_2] : memref<784x128xf32, #tpu.memory_space<vmem>>, vector<784x128xf32>
    %cst = arith.constant dense<0.000000e+00> : vector<8x128xf32>
    %2 = tpu.matmul %0, %1, %cst {dimension_numbers = #tpu.dot_dimension_numbers<[1], [0], [0], [1], [0, 0, 1, 1], [], []>} : vector<8x784xf32>, vector<784x128xf32>, vector<8x128xf32> -> vector<8x128xf32>
    %c0_3 = arith.constant 0 : index
    %c0_4 = arith.constant 0 : index
    %3 = vector.load %arg3[%c0_3, %c0_4] : memref<1x128xf32, #tpu.memory_space<vmem>>, vector<1x128xf32>
    %4 = vector.broadcast %3 : vector<1x128xf32> to vector<8x128xf32>
    %5 = arith.addf %2, %4 : vector<8x128xf32>
    %cst_5 = arith.constant 0.000000e+00 : f32
    %6 = vector.broadcast %cst_5 : f32 to vector<8x128xf32>
    %7 = arith.maximumf %5, %6 : vector<8x128xf32>
    %c0_6 = arith.constant 0 : index
    %c0_7 = arith.constant 0 : index
    %8 = vector.load %arg4[%c0_6, %c0_7] : memref<128x128xf32, #tpu.memory_space<vmem>>, vector<128x128xf32>
    %cst_8 = arith.constant dense<0.000000e+00> : vector<8x128xf32>
    %9 = tpu.matmul %7, %8, %cst_8 {dimension_numbers = #tpu.dot_dimension_numbers<[1], [0], [0], [1], [0, 0, 1, 1], [], []>} : vector<8x128xf32>, vector<128x128xf32>, vector<8x128xf32> -> vector<8x128xf32>
    %c0_9 = arith.constant 0 : index
    %c0_10 = arith.constant 0 : index
    %10 = vector.load %arg5[%c0_9, %c0_10] : memref<1x128xf32, #tpu.memory_space<vmem>>, vector<1x128xf32>
    %11 = vector.broadcast %10 : vector<1x128xf32> to vector<8x128xf32>
    %12 = arith.addf %9, %11 : vector<8x128xf32>
    %cst_11 = arith.constant 0.000000e+00 : f32
    %13 = vector.broadcast %cst_11 : f32 to vector<8x128xf32>
    %14 = arith.maximumf %12, %13 : vector<8x128xf32>
    %c0_12 = arith.constant 0 : index
    %c0_13 = arith.constant 0 : index
    %15 = vector.load %arg6[%c0_12, %c0_13] : memref<8x128xf32, #tpu.memory_space<vmem>>, vector<8x128xf32>
    tpu.vector_store %arg6[%c0_12, %c0_13], %14 {strides = array<i32>} : memref<8x128xf32, #tpu.memory_space<vmem>>, vector<8x128xf32>,
    return
  }
  func.func @transform_0(%arg0: i32) -> (i32, i32) {
    %c0_i32 = arith.constant 0 : i32
    %c0_i32_0 = arith.constant 0 : i32
    return %arg0, %c0_i32 : i32, i32
  }
  func.func @transform_1(%arg0: i32) -> (i32, i32) {
    %c0_i32 = arith.constant 0 : i32
    %c0_i32_0 = arith.constant 0 : i32
    %c0_i32_1 = arith.constant 0 : i32
    return %c0_i32, %c0_i32_0 : i32, i32
  }
  func.func @transform_2(%arg0: i32) -> (i32, i32) {
    %c0_i32 = arith.constant 0 : i32
    %c0_i32_0 = arith.constant 0 : i32
    %c0_i32_1 = arith.constant 0 : i32
    return %c0_i32, %c0_i32_0 : i32, i32
  }
  func.func @transform_3(%arg0: i32) -> (i32, i32) {
    %c0_i32 = arith.constant 0 : i32
    %c0_i32_0 = arith.constant 0 : i32
    %c0_i32_1 = arith.constant 0 : i32
    return %c0_i32, %c0_i32_0 : i32, i32
  }
  func.func @transform_4(%arg0: i32) -> (i32, i32) {
    %c0_i32 = arith.constant 0 : i32
    %c0_i32_0 = arith.constant 0 : i32
    %c0_i32_1 = arith.constant 0 : i32
    return %c0_i32, %c0_i32_0 : i32, i32
  }
  func.func @transform_5(%arg0: i32) -> (i32, i32) {
    %c0_i32 = arith.constant 0 : i32
    %c0_i32_0 = arith.constant 0 : i32
    return %arg0, %c0_i32 : i32, i32
  }
}

</mosaic_0001>

<bundles_post_ra>
// kernel: client_model_forward.1
= control target key start
LH: loop header
LB: loop body
LE: loop exit
PB: predicated region body
PF: predicated region fallthrough
CT: control target
= control target key end

     0   :  { %s766_s0 = inlined_call_operand.vmem [shape: f32[8,784], index: 0, kind: input, shape index: {}]   ;;  %s767_s1 = inlined_call_operand.vmem [shape: f32[784,128], index: 1, kind: input, shape index: {}]   ;;  %s768_s2 = inlined_call_operand.vmem [shape: f32[1,128], index: 2, kind: input, shape index: {}]   ;;  %s769_s3 = inlined_call_operand.vmem [shape: f32[128,128], index: 3, kind: input, shape index: {}]   ;;  %s770_s4 = inlined_call_operand.vmem [shape: f32[1,128], index: 4, kind: input, shape index: {}]   ;;  %s771_s5 = inlined_call_operand.hbm [shape: f32[8,128], index: 5, kind: output, shape index: {}]  }
   0x1   :  { %v43_v0 = vld [vmem:[%s767_s1 + $0x78] sm:$0xff]  ;;  %v42_v1 = vld [vmem:[%s767_s1 + $0x70] sm:$0xff]  ;;  %v41_v4 = vld [vmem:[%s767_s1 + $0x68] sm:$0xff] }
   0x2   :  { %v59_v2 = vld [vmem:[%s767_s1 + $0xf8] sm:$0xff]  ;;  %134 = vmatpush.msra.mxu0 %v43_v0  ;;  %v58_v3 = vld [vmem:[%s767_s1 + $0xf0] sm:$0xff]  ;;  %v57_v5 = vld [vmem:[%s767_s1 + $0xe8] sm:$0xff] }
   0x3   :  { %154 = vmatpush.msra.mxu1 %v59_v2  ;;  %v40_v6 = vld [vmem:[%s767_s1 + $0x60] sm:$0xff]  ;;  %v39_v8 = vld [vmem:[%s767_s1 + $0x58] sm:$0xff]  ;;  %v38_v10 = vld [vmem:[%s767_s1 + $0x50] sm:$0xff] }
   0x4   :  { %135 = vmatpush.msra.mxu0 %v42_v1  ;;  %v56_v7 = vld [vmem:[%s767_s1 + $0xe0] sm:$0xff]  ;;  %v55_v9 = vld [vmem:[%s767_s1 + $0xd8] sm:$0xff]  ;;  %v54_v12 = vld [vmem:[%s767_s1 + $0xd0] sm:$0xff] }
   0x5   :  { %155 = vmatpush.msra.mxu1 %v58_v3  ;;  %v75_v11 = vld [vmem:[%s767_s1 + $0x178] sm:$0xff]  ;;  %v74_v13 = vld [vmem:[%s767_s1 + $0x170] sm:$0xff]  ;;  %v73_v15 = vld [vmem:[%s767_s1 + $0x168] sm:$0xff] }
   0x6   :  { %136 = vmatpush.msra.mxu0 %v41_v4  ;;  %174 = vmatpush.msra.mxu2 %v75_v11  ;;  %v91_v14 = vld [vmem:[%s767_s1 + $0x1f8] sm:$0xff]  ;;  %v90_v16 = vld [vmem:[%s767_s1 + $0x1f0] sm:$0xff]  ;;  %v37_v17 = vld [vmem:[%s767_s1 + $0x48] sm:$0xff] }
   0x7   :  { %156 = vmatpush.msra.mxu1 %v57_v5  ;;  %v53_v18 = vld [vmem:[%s767_s1 + $0xc8] sm:$0xff]  ;;  %194 = vmatpush.msra.mxu3 %v91_v14  ;;  %v72_v19 = vld [vmem:[%s767_s1 + $0x160] sm:$0xff]  ;;  %v71_v23 = vld [vmem:[%s767_s1 + $0x158] sm:$0xff] }
   0x8   :  { %137 = vmatpush.msra.mxu0 %v40_v6  ;;  %175 = vmatpush.msra.mxu2 %v74_v13  ;;  %v89_v20 = vld [vmem:[%s767_s1 + $0x1e8] sm:$0xff]  ;;  %v36_v21 = vld [vmem:[%s767_s1 + $0x40] sm:$0xff]  ;;  %v35_v25 = vld [vmem:[%s767_s1 + $0x38] sm:$0xff] }
   0x9   :  { %157 = vmatpush.msra.mxu1 %v56_v7  ;;  %v52_v22 = vld [vmem:[%s767_s1 + $0xc0] sm:$0xff]  ;;  %195 = vmatpush.msra.mxu3 %v90_v16  ;;  %v51_v26 = vld [vmem:[%s767_s1 + $0xb8] sm:$0xff]  ;;  %v70_v27 = vld [vmem:[%s767_s1 + $0x150] sm:$0xff] }
   0xa   :  { %138 = vmatpush.msra.mxu0 %v39_v8  ;;  %176 = vmatpush.msra.mxu2 %v73_v15  ;;  %v88_v24 = vld [vmem:[%s767_s1 + $0x1e0] sm:$0xff]  ;;  %v87_v28 = vld [vmem:[%s767_s1 + $0x1d8] sm:$0xff]  ;;  %v34_v29 = vld [vmem:[%s767_s1 + $0x30] sm:$0xff] }
   0xb   :  { %158 = vmatpush.msra.mxu1 %v55_v9  ;;  %196 = vmatpush.msra.mxu3 %v89_v20  ;;  %v50_v30 = vld [vmem:[%s767_s1 + $0xb0] sm:$0xff]  ;;  %v69_v31 = vld [vmem:[%s767_s1 + $0x148] sm:$0xff]  ;;  %v68_v35 = vld [vmem:[%s767_s1 + $0x140] sm:$0xff] }
   0xc   :  { %139 = vmatpush.msra.mxu0 %v38_v10  ;;  %177 = vmatpush.msra.mxu2 %v72_v19  ;;  %v86_v32 = vld [vmem:[%s767_s1 + $0x1d0] sm:$0xff]  ;;  %v33_v33 = vld [vmem:[%s767_s1 + $0x28] sm:$0xff]  ;;  %v32_v37 = vld [vmem:[%s767_s1 + $0x20] sm:$0xff] }
   0xd   :  { %159 = vmatpush.msra.mxu1 %v54_v12  ;;  %197 = vmatpush.msra.mxu3 %v88_v24  ;;  %v49_v34 = vld [vmem:[%s767_s1 + $0xa8] sm:$0xff]  ;;  %v48_v38 = vld [vmem:[%s767_s1 + $0xa0] sm:$0xff]  ;;  %v67_v39 = vld [vmem:[%s767_s1 + $0x138] sm:$0xff] }
   0xe   :  { %140 = vmatpush.msra.mxu0 %v37_v17  ;;  %178 = vmatpush.msra.mxu2 %v71_v23  ;;  %v85_v36 = vld [vmem:[%s767_s1 + $0x1c8] sm:$0xff]  ;;  %v84_v40 = vld [vmem:[%s767_s1 + $0x1c0] sm:$0xff]  ;;  %v31_v41 = vld [vmem:[%s767_s1 + $0x18] sm:$0xff] }
   0xf   :  { %160 = vmatpush.msra.mxu1 %v53_v18  ;;  %198 = vmatpush.msra.mxu3 %v87_v28  ;;  %v47_v42 = vld [vmem:[%s767_s1 + $0x98] sm:$0xff]  ;;  %v66_v43 = vld [vmem:[%s767_s1 + $0x130] sm:$0xff]  ;;  %v65_v47 = vld [vmem:[%s767_s1 + $0x128] sm:$0xff] }
  0x10   :  { %141 = vmatpush.msra.mxu0 %v36_v21  ;;  %179 = vmatpush.msra.mxu2 %v70_v27  ;;  %v83_v44 = vld [vmem:[%s767_s1 + $0x1b8] sm:$0xff]  ;;  %v30_v45 = vld [vmem:[%s767_s1 + $0x10] sm:$0xff]  ;;  %v29_v49 = vld [vmem:[%s767_s1 + $0x8] sm:$0xff] }
  0x11   :  { %161 = vmatpush.msra.mxu1 %v52_v22  ;;  %199 = vmatpush.msra.mxu3 %v86_v32  ;;  %v46_v46 = vld [vmem:[%s767_s1 + $0x90] sm:$0xff]  ;;  %v45_v50 = vld [vmem:[%s767_s1 + $0x88] sm:$0xff]  ;;  %v64_v51 = vld [vmem:[%s767_s1 + $0x120] sm:$0xff] }
  0x12   :  { %142 = vmatpush.msra.mxu0 %v35_v25  ;;  %180 = vmatpush.msra.mxu2 %v69_v31  ;;  %v82_v48 = vld [vmem:[%s767_s1 + $0x1b0] sm:$0xff]  ;;  %v81_v52 = vld [vmem:[%s767_s1 + $0x1a8] sm:$0xff]  ;;  %v28_v53 = vld [vmem:[%s767_s1] sm:$0xff] }
  0x13   :  { %162 = vmatpush.msra.mxu1 %v51_v26  ;;  %200 = vmatpush.msra.mxu3 %v85_v36  ;;  %v44_v54 = vld [vmem:[%s767_s1 + $0x80] sm:$0xff]  ;;  %v107_v55 = vld [vmem:[%s767_s1 + $0x278] sm:$0xff]  ;;  %v106_v59 = vld [vmem:[%s767_s1 + $0x270] sm:$0xff] }
  0x14   :  { %143 = vmatpush.msra.mxu0 %v34_v29  ;;  %181 = vmatpush.msra.mxu2 %v68_v35  ;;  %v123_v56 = vld [vmem:[%s767_s1 + $0x2f8] sm:$0xff]  ;;  %v80_v58 = vld [vmem:[%s767_s1 + $0x1a0] sm:$0xff]  ;;  %v122_v60 = vld [vmem:[%s767_s1 + $0x2f0] sm:$0xff] }
  0x15   :  { %163 = vmatpush.msra.mxu1 %v50_v30  ;;  %201 = vmatpush.msra.mxu3 %v84_v40  ;;  %v63_v57 = vld [vmem:[%s767_s1 + $0x118] sm:$0xff]  ;;  %v62_v61 = vld [vmem:[%s767_s1 + $0x110] sm:$0xff]  ;;  %v105_v63 = vld [vmem:[%s767_s1 + $0x268] sm:$0xff] }
  0x16   :  { %144 = vmatpush.msra.mxu0 %v33_v33  ;;  %182 = vmatpush.msra.mxu2 %v67_v39  ;;  %v79_v62 = vld [vmem:[%s767_s1 + $0x198] sm:$0xff]  ;;  %v121_v0 = vld [vmem:[%s767_s1 + $0x2e8] sm:$0xff]  ;;  %v78_v2 = vld [vmem:[%s767_s1 + $0x190] sm:$0xff] }
  0x17   :  { %164 = vmatpush.msra.mxu1 %v49_v34  ;;  %202 = vmatpush.msra.mxu3 %v83_v44  ;;  %v61_v1 = vld [vmem:[%s767_s1 + $0x108] sm:$0xff]  ;;  %v104_v3 = vld [vmem:[%s767_s1 + $0x260] sm:$0xff]  ;;  %v103_v5 = vld [vmem:[%s767_s1 + $0x258] sm:$0xff] }
  0x18   :  { %145 = vmatpush.msra.mxu0 %v32_v37  ;;  %183 = vmatpush.msra.mxu2 %v66_v43  ;;  %v120_v4 = vld [vmem:[%s767_s1 + $0x2e0] sm:$0xff]  ;;  %v77_v7 = vld [vmem:[%s767_s1 + $0x188] sm:$0xff]  ;;  %v119_v8 = vld [vmem:[%s767_s1 + $0x2d8] sm:$0xff] }
  0x19   :  { %165 = vmatpush.msra.mxu1 %v48_v38  ;;  %203 = vmatpush.msra.mxu3 %v82_v48  ;;  %v60_v6 = vld [vmem:[%s767_s1 + $0x100] sm:$0xff]  ;;  %v23_v9 = vld [vmem:[%s766_s0 + $0x10] sm:$0xff] }
  0x1a   :  { %146 = vmatpush.msra.mxu0 %v31_v41  ;;  %184 = vmatpush.msra.mxu2 %v65_v47  ;;  %v76_v10 = vld [vmem:[%s767_s1 + $0x180] sm:$0xff] }
  0x1b   :  { %166 = vmatpush.msra.mxu1 %v47_v42  ;;  %204 = vmatpush.msra.mxu3 %v81_v52 }
  0x1c   :  { %147 = vmatpush.msra.mxu0 %v30_v45  ;;  %185 = vmatpush.msra.mxu2 %v64_v51 }
  0x1d   :  { %167 = vmatpush.msra.mxu1 %v46_v46  ;;  %205 = vmatpush.msra.mxu3 %v80_v58 }
  0x1e   :  { %148 = vmatpush.msra.mxu0 %v29_v49  ;;  %186 = vmatpush.msra.mxu2 %v63_v57 }
  0x1f   :  { %168 = vmatpush.msra.mxu1 %v45_v50  ;;  %206 = vmatpush.msra.mxu3 %v79_v62 }
  0x20   :  { %149 = vmatpush.msra.mxu0 %v28_v53  ;;  %187 = vmatpush.msra.mxu2 %v62_v61 }
  0x21   :  { %169 = vmatpush.msra.mxu1 %v44_v54  ;;  %207 = vmatpush.msra.mxu3 %v78_v2 }
  0x22   :  { %214 = vmatpush.msrb.mxu0 %v107_v55  ;;  %188 = vmatpush.msra.mxu2 %v61_v1 }
  0x23   :  { %234 = vmatpush.msrb.mxu1 %v123_v56 }
  0x24   :  { %215 = vmatpush.msrb.mxu0 %v106_v59 }
  0x25   :  { %235 = vmatpush.msrb.mxu1 %v122_v60 }
  0x26   :  { %216 = vmatpush.msrb.mxu0 %v105_v63 }
  0x27   :  { %236 = vmatpush.msrb.mxu1 %v121_v0 }
  0x28   :  { %217 = vmatpush.msrb.mxu0 %v104_v3 }
  0x29   :  { %237 = vmatpush.msrb.mxu1 %v120_v4 }
  0x2a   :  { %10 = vsyncpa [#allocation3], 0  ;;  %v102_v11 = vld [vmem:[%s767_s1 + $0x250] sm:$0xff]  ;;  %189 = vmatpush.msra.mxu2 %v60_v6  ;;  %208 = vmatpush.msra.mxu3 %v77_v7  ;;  %v125_v13 = vld [vmem:[%s767_s1 + $0x308] sm:$0xff]  ;;  %vm130_vm0 = vcmask 130048   ;;  %s324_s14 = sshll.u32 %s771_s5, 4  ;;  %s325_s14 = int_to_ptr.hbm [resolvable:$true] %s324_s14 }
  0x2b   :  { %v118_v12 = vld [vmem:[%s767_s1 + $0x2d0] sm:$0xff]  ;;  %218 = vmatpush.msrb.mxu0 %v103_v5  ;;  %238 = vmatpush.msrb.mxu1 %v119_v8  ;;  %v21_v14 = vld [vmem:[%s766_s0] sm:$0xff]  ;;  %v101_v15 = vld [vmem:[%s767_s1 + $0x248] sm:$0xff] }
  0x2c   :  { %v117_v16 = vld [vmem:[%s767_s1 + $0x2c8] sm:$0xff]  ;;  %190 = vmatmul.f32.vlgmr.msra.gmra.mxu2 %v23_v9  ;;  %209 = vmatpush.msra.mxu3 %v76_v10  ;;  %v24_v17 = vld [vmem:[%s766_s0 + $0x18] sm:$0xff]  ;;  %v100_v19 = vld [vmem:[%s767_s1 + $0x240] sm:$0xff] }
  0x2d   :  { %219 = vmatpush.msrb.mxu0 %v102_v11  ;;  %239 = vmatpush.msrb.mxu1 %v118_v12  ;;  %v22_v18 = vld [vmem:[%s766_s0 + $0x8] sm:$0xff]  ;;  %v116_v20 = vld [vmem:[%s767_s1 + $0x2c0] sm:$0xff]  ;;  %v290_v22 = vld [vmem:[%s769_s3 + $0x78] sm:$0xff] }
  0x2e   :  { %268 = vmatpush.msrb.mxu2 %v125_v13  ;;  %150 = vmatmul.f32.vlgmr.msra.gmra.mxu0 %v21_v14  ;;  %v124_v21 = vld [vmem:[%s767_s1 + $0x300] sm:$0xff]  ;;  %v99_v23 = vld [vmem:[%s767_s1 + $0x238] sm:$0xff]  ;;  %v27_v25 = vld [vmem:[%s766_s0 + $0x30] sm:$0xff] }
  0x2f   :  { %220 = vmatpush.msrb.mxu0 %v101_v15  ;;  %240 = vmatpush.msrb.mxu1 %v117_v16  ;;  %v115_v24 = vld [vmem:[%s767_s1 + $0x2b8] sm:$0xff]  ;;  %v289_v26 = vld [vmem:[%s769_s3 + $0x70] sm:$0xff]  ;;  %v288_v29 = vld [vmem:[%s769_s3 + $0x68] sm:$0xff] }
  0x30   :  { %210 = vmatmul.f32.vlgmr.msra.gmra.mxu3 %v24_v17  ;;  %170 = vmatmul.f32.vlgmr.msra.gmra.mxu1 %v22_v18  ;;  %v98_v27 = vld [vmem:[%s767_s1 + $0x230] sm:$0xff]  ;;  %v97_v30 = vld [vmem:[%s767_s1 + $0x228] sm:$0xff]  ;;  %v287_v32 = vld [vmem:[%s769_s3 + $0x60] sm:$0xff] }
  0x31   :  { %221 = vmatpush.msrb.mxu0 %v100_v19  ;;  %241 = vmatpush.msrb.mxu1 %v116_v20  ;;  %v114_v28 = vld [vmem:[%s767_s1 + $0x2b0] sm:$0xff]  ;;  %v113_v31 = vld [vmem:[%s767_s1 + $0x2a8] sm:$0xff]  ;;  %v96_v33 = vld [vmem:[%s767_s1 + $0x220] sm:$0xff] }
  0x32   :  { %269 = vmatpush.msrb.mxu2 %v124_v21  ;;  %295 = vmatpush.msrb.mxu3 %v290_v22  ;;  %v112_v34 = vld [vmem:[%s767_s1 + $0x2a0] sm:$0xff]  ;;  %v286_v35 = vld [vmem:[%s769_s3 + $0x58] sm:$0xff]  ;;  %v285_v38 = vld [vmem:[%s769_s3 + $0x50] sm:$0xff] }
  0x33   :  { %222 = vmatpush.msrb.mxu0 %v99_v23  ;;  %242 = vmatpush.msrb.mxu1 %v115_v24  ;;  %v95_v36 = vld [vmem:[%s767_s1 + $0x218] sm:$0xff]  ;;  %v94_v39 = vld [vmem:[%s767_s1 + $0x210] sm:$0xff]  ;;  %v284_v41 = vld [vmem:[%s769_s3 + $0x48] sm:$0xff] }
  0x34   :  { %333 = vmatmul.msk.f32.vlgmr.msrb.gmra.mxu2 %vm130_vm0, %v27_v25  ;;  %296 = vmatpush.msrb.mxu3 %v289_v26  ;;  %v111_v37 = vld [vmem:[%s767_s1 + $0x298] sm:$0xff]  ;;  %v110_v40 = vld [vmem:[%s767_s1 + $0x290] sm:$0xff]  ;;  %v93_v42 = vld [vmem:[%s767_s1 + $0x208] sm:$0xff] }
  0x35   :  { %223 = vmatpush.msrb.mxu0 %v98_v27  ;;  %243 = vmatpush.msrb.mxu1 %v114_v28  ;;  %v109_v43 = vld [vmem:[%s767_s1 + $0x288] sm:$0xff]  ;;  %v92_v44 = vld [vmem:[%s767_s1 + $0x200] sm:$0xff]  ;;  %v282_v49 = vld [vmem:[%s769_s3 + $0x38] sm:$0xff] }
  0x36   :  { %297 = vmatpush.msrb.mxu3 %v288_v29  ;;  %v108_v45 = vld [vmem:[%s767_s1 + $0x280] sm:$0xff]  ;;  %v26_v47 = vld [vmem:[%s766_s0 + $0x28] sm:$0xff]  ;;  %v281_v50 = vld [vmem:[%s769_s3 + $0x30] sm:$0xff] }
  0x37   :  { %224 = vmatpush.msrb.mxu0 %v97_v30  ;;  %244 = vmatpush.msrb.mxu1 %v113_v31  ;;  %v25_v46 = vld [vmem:[%s766_s0 + $0x20] sm:$0xff]  ;;  %v280_v51 = vld [vmem:[%s769_s3 + $0x28] sm:$0xff]  ;;  %v278_v53 = vld [vmem:[%s769_s3 + $0x18] sm:$0xff] }
  0x38   :  { %298 = vmatpush.msrb.mxu3 %v287_v32  ;;  %v283_v48 = vld [vmem:[%s769_s3 + $0x40] sm:$0xff]  ;;  %v277_v54 = vld [vmem:[%s769_s3 + $0x10] sm:$0xff]  ;;  %v276_v55 = vld [vmem:[%s769_s3 + $0x8] sm:$0xff] }
  0x39   :  { %225 = vmatpush.msrb.mxu0 %v96_v33  ;;  %245 = vmatpush.msrb.mxu1 %v112_v34  ;;  %v279_v52 = vld [vmem:[%s769_s3 + $0x20] sm:$0xff] }
  0x3a   :  { %299 = vmatpush.msrb.mxu3 %v286_v35  ;;  %v275_v56 = vld [vmem:[%s769_s3] sm:$0xff] }
  0x3b   :  { %226 = vmatpush.msrb.mxu0 %v95_v36  ;;  %246 = vmatpush.msrb.mxu1 %v111_v37  ;;  %v335_v57 = vld [vmem:[%s768_s2] ss:$0 sm:$0xff]  ;;  %s363_s2 = smov [#allocation2]  }
  0x3c   :  { %300 = vmatpush.msrb.mxu3 %v285_v38  ;;  %v336_v9 = vld [vmem:[%s770_s4] ss:$0 sm:$0xff]  ;;  %s322_s11 = sshll.u32 %s363_s2, 4  ;;  %s323_s11 = int_to_ptr.vmem [resolvable:$true] %s322_s11 }
  0x3d   :  { %227 = vmatpush.msrb.mxu0 %v94_v39  ;;  %247 = vmatpush.msrb.mxu1 %v110_v40 }
  0x3e   :  { %301 = vmatpush.msrb.mxu3 %v284_v41 }
  0x3f   :  { %228 = vmatpush.msrb.mxu0 %v93_v42  ;;  %248 = vmatpush.msrb.mxu1 %v109_v43 }
  0x40   :  { %302 = vmatpush.msrb.mxu3 %v283_v48 }
  0x41   :  { %229 = vmatpush.msrb.mxu0 %v92_v44  ;;  %249 = vmatpush.msrb.mxu1 %v108_v45 }
  0x42   :  { %230 = vmatmul.f32.vlgmr.msrb.gmra.mxu0 %v25_v46  ;;  %250 = vmatmul.f32.vlgmr.msrb.gmra.mxu1 %v26_v47 }
  0x43   :  { %303 = vmatpush.msrb.mxu3 %v282_v49 }
  0x45   :  { %304 = vmatpush.msrb.mxu3 %v281_v50 }
  0x47   :  { %305 = vmatpush.msrb.mxu3 %v280_v51 }
  0x49   :  { %306 = vmatpush.msrb.mxu3 %v279_v52 }
  0x4b   :  { %307 = vmatpush.msrb.mxu3 %v278_v53 }
  0x4d   :  { %308 = vmatpush.msrb.mxu3 %v277_v54 }
  0x4f   :  { %309 = vmatpush.msrb.mxu3 %v276_v55 }
  0x51   :  { %310 = vmatpush.msrb.mxu3 %v275_v56 }
  0xab   :  { %v151_v58 = vpop.f32.mrf.mxu0 }
  0xac   :  { %v152_v59 = vadd.f32 %v335_v57, %v151_v58 }
  0xad   :  { %v171_v60 = vpop.f32.mrf.mxu1 }
  0xae   :  { %v172_v61 = vadd.f32 %v171_v60, %v152_v59 }
  0xaf   :  { %v191_v62 = vpop.f32.mrf.mxu2 }
  0xb0   :  { %v192_v63 = vadd.f32 %v191_v62, %v172_v61 }
  0xb3   :  { %v211_v0 = vpop.f32.mrf.mxu3 }
  0xb4   :  { %v212_v1 = vadd.f32 %v211_v0, %v192_v63 }
  0xb7   :  { %v271_v5 = vpop.f32.mrf.mxu2 }
  0xbf   :  { %v231_v2 = vpop.f32.mrf.mxu0  ;;  %v251_v3 = vpop.f32.mrf.mxu1 }
  0xc0   :  { %v232_v4 = vadd.f32 %v231_v2, %v212_v1 }
  0xc2   :  { %v252_v6 = vadd.f32 %v251_v3, %v232_v4 }
  0xc4   :  { %v272_v7 = vadd.f32 %v271_v5, %v252_v6 }
  0xc6   :  { %v274_v8 = vmax.f32 %v272_v7, 0.0 }
  0xc8   :  { %311 = vmatmul.f32.vlgmr.msrb.gmra.mxu3 %v274_v8 }
 0x14b   :  { %v312_v10 = vpop.f32.mrf.mxu3 }
 0x14c   :  { %v313_v11 = vadd.f32 %v336_v9, %v312_v10 }
 0x14e   :  { %v315_v12 = vmax.f32 %v313_v11, 0.0 }
 0x150   :  { %316 = vst [vmem:[#allocation2] sm:$0xff] %v315_v12 }
 0x151   :  { %327 = dma.vmem_to_hbm [thread:$0]  %s323_s11, 128, %s325_s14, [#allocation3]  }
 0x152   :  { %361 = dma.done.wait [#allocation3], 128  }
 0x153   :  { %362 = vsyncadd [#allocation3], 4294967168 }
 0x154   :  { %332 = vsyncpa [#allocation3], 1 }

</bundles_post_ra>
